<compile_context>
chip_gen: v7x
topology: tpu7x:2x2x1
jax: 0.10.0
libtpu: 0.0.40
codegen_flags: <defaults>
</compile_context>

<pallas_src>
import math
import functools

import jax
import jax.numpy as jnp
from jax import lax
from jax.experimental import pallas as pl
from jax.experimental.pallas import tpu as pltpu

LN_EPS = 1e-5  # torch.nn.LayerNorm default eps


def _erf(x):
    # Abramowitz & Stegun 7.1.26 polynomial (max abs err ~1.5e-7), f32 math.
    a1, a2, a3, a4, a5 = (0.254829592, -0.284496736, 1.421413741,
                          -1.453152027, 1.061405429)
    p = 0.3275911
    s = jnp.where(x >= 0.0, 1.0, -1.0)
    ax = jnp.abs(x)
    t = 1.0 / (1.0 + p * ax)
    poly = ((((a5 * t + a4) * t + a3) * t + a2) * t + a1) * t
    return s * (1.0 - poly * jnp.exp(-ax * ax))


def _gelu_exact(x):
    # F.gelu default ('none') = exact erf-based GELU, evaluated in f32.
    return 0.5 * x * (1.0 + _erf(x * (1.0 / math.sqrt(2.0))))


def _layernorm(x, gamma, beta):
    mu = jnp.mean(x, axis=-1, keepdims=True)
    var = jnp.mean((x - mu) ** 2, axis=-1, keepdims=True)
    return (x - mu) * lax.rsqrt(var + LN_EPS) * gamma + beta


def block_kernel(x_ref,
                 g1_ref, b1_ref,
                 wqkv_ref, bqkv_ref,
                 wp_ref, bp_ref,
                 g2_ref, b2_ref,
                 w1_ref, bf1_ref, w2_ref, bf2_ref,
                 o_ref,
                 y_ref,                      # VMEM scratch (T, C) f32
                 *, n_head):
    x = x_ref[0]                             # (T, C) f32, one batch element
    T, C = x.shape
    hd = C // n_head
    scale = 1.0 / math.sqrt(hd)

    # ---- ln1 + fused QKV projection (bf16 operands, f32 accumulate) ----
    h = _layernorm(x, g1_ref[...], b1_ref[...]).astype(jnp.bfloat16)
    qkv = jnp.dot(h, wqkv_ref[...],
                  preferred_element_type=jnp.float32) + bqkv_ref[...]
    q = qkv[:, 0 * C:1 * C].astype(jnp.bfloat16)
    k = qkv[:, 1 * C:2 * C].astype(jnp.bfloat16)
    v = qkv[:, 2 * C:3 * C].astype(jnp.bfloat16)

    # Causal mask built once, shared by every head (same as the tril buffer).
    row = lax.broadcasted_iota(jnp.int32, (T, T), 0)
    col = lax.broadcasted_iota(jnp.int32, (T, T), 1)
    causal = row >= col

    # ---- per-head attention; head outputs written directly into scratch ----
    for hh in range(n_head):                 # static unroll; no concatenate
        sl = slice(hh * hd, (hh + 1) * hd)
        qh, kh, vh = q[:, sl], k[:, sl], v[:, sl]
        # q @ k^T without materializing a transpose.
        att = lax.dot_general(qh, kh, (((1,), (1,)), ((), ())),
                              preferred_element_type=jnp.float32) * scale
        att = jnp.where(causal, att, -jnp.inf)
        att = att - jnp.max(att, axis=-1, keepdims=True)    # stable softmax
        p = jnp.exp(att)
        denom = jnp.sum(p, axis=-1, keepdims=True)
        yh = jnp.dot(p.astype(jnp.bfloat16), vh,
                     preferred_element_type=jnp.float32)
        # Fold 1/denom in after p@v; approx reciprocal runs on the EUP.
        y_ref[:, sl] = yh * pl.reciprocal(denom, approx=True)

    y = y_ref[...].astype(jnp.bfloat16)
    attn_out = jnp.dot(y, wp_ref[...],
                       preferred_element_type=jnp.float32) + bp_ref[...]
    x = x + attn_out                         # first residual

    # ---- ln2 + MLP ----
    h2 = _layernorm(x, g2_ref[...], b2_ref[...]).astype(jnp.bfloat16)
    u = jnp.dot(h2, w1_ref[...],
                preferred_element_type=jnp.float32) + bf1_ref[...]
    u = _gelu_exact(u).astype(jnp.bfloat16)
    m = jnp.dot(u, w2_ref[...],
                preferred_element_type=jnp.float32) + bf2_ref[...]

    o_ref[0] = x + m                         # second residual


def _build_block_call(B, T, C, n_head):
    H = 4 * C

    def wspec(shape):
        # Weights / biases: constant block index across the batch grid.
        return pl.BlockSpec(shape, lambda b: (0,) * len(shape))

    in_specs = [
        pl.BlockSpec((1, T, C), lambda b: (b, 0, 0)),   # x: one batch row/step
        wspec((1, C)), wspec((1, C)),                   # ln1 gamma/beta
        wspec((C, 3 * C)), wspec((1, 3 * C)),           # fused Wqkv, bqkv
        wspec((C, C)), wspec((1, C)),                   # Wproj, bproj
        wspec((1, C)), wspec((1, C)),                   # ln2 gamma/beta
        wspec((C, H)), wspec((1, H)),                   # Wfc1, bfc1
        wspec((H, C)), wspec((1, C)),                   # Wfc2, bfc2
    ]

    kernel = functools.partial(block_kernel, n_head=n_head)
    return pl.pallas_call(
        kernel,
        out_shape=jax.ShapeDtypeStruct((B, T, C), jnp.float32),
        grid_spec=pltpu.PrefetchScalarGridSpec(
            num_scalar_prefetch=0,
            grid=(B,),
            in_specs=in_specs,
            out_specs=pl.BlockSpec((1, T, C), lambda b: (b, 0, 0)),
            scratch_shapes=[pltpu.VMEM((T, C), jnp.float32)],   # head assembly
        ),
        compiler_params=pltpu.CompilerParams(
            dimension_semantics=("parallel",),          # batch across cores
        ),
    )


def transformer_block(x, params, n_head):
    B, T, C = x.shape
    bf16 = jnp.bfloat16

    def t(w):            # PyTorch (out, in) -> (in, out), bf16 for the MXU
        return jnp.transpose(w).astype(bf16)

    def v2(b):           # (n,) -> (1, n) so it sits in lanes; stays f32
        return b.reshape(1, -1).astype(jnp.float32)

    wqkv = jnp.concatenate(
        [jnp.transpose(params['wq']),
         jnp.transpose(params['wk']),
         jnp.transpose(params['wv'])], axis=1).astype(bf16)      # (C, 3C)
    bqkv = jnp.concatenate(
        [params['bq'], params['bk'], params['bv']]).reshape(1, -1)

    args = (
        x,
        v2(params['ln1_g']), v2(params['ln1_b']),
        wqkv, bqkv,
        t(params['wp']), v2(params['bp']),
        v2(params['ln2_g']), v2(params['ln2_b']),
        t(params['w1']), v2(params['b1']),
        t(params['w2']), v2(params['b2']),
    )

    call = _build_block_call(B, T, C, n_head)
    return call(*args)


def init_params(key, C):
    """Deterministic synthetic parameters (PyTorch layout: Linear W is (out,in))."""
    H = 4 * C
    names_shapes = [
        ('wq', (C, C)), ('bq', (C,)),
        ('wk', (C, C)), ('bk', (C,)),
        ('wv', (C, C)), ('bv', (C,)),
        ('wp', (C, C)), ('bp', (C,)),
        ('w1', (H, C)), ('b1', (H,)),
        ('w2', (C, H)), ('b2', (C,)),
    ]
    keys = jax.random.split(key, len(names_shapes))
    params = {n: jax.random.normal(k, s, jnp.float32) * 0.02
              for (n, s), k in zip(names_shapes, keys)}
    params['ln1_g'] = jnp.ones((C,), jnp.float32)
    params['ln1_b'] = jnp.zeros((C,), jnp.float32)
    params['ln2_g'] = jnp.ones((C,), jnp.float32)
    params['ln2_b'] = jnp.zeros((C,), jnp.float32)
    return params


def reference_block(x, params, n_head):
    """Pure-JAX f32 reference mirroring the PyTorch forward (eval mode)."""
    def ln(z, g, b):
        mu = jnp.mean(z, -1, keepdims=True)
        var = jnp.mean((z - mu) ** 2, -1, keepdims=True)
        return (z - mu) / jnp.sqrt(var + LN_EPS) * g + b

    def lin(z, w, b):
        return z @ w.T + b

    B, T, C = x.shape
    hd = C // n_head
    h = ln(x, params['ln1_g'], params['ln1_b'])
    q = lin(h, params['wq'], params['bq']).reshape(B, T, n_head, hd).transpose(0, 2, 1, 3)
    k = lin(h, params['wk'], params['bk']).reshape(B, T, n_head, hd).transpose(0, 2, 1, 3)
    v = lin(h, params['wv'], params['bv']).reshape(B, T, n_head, hd).transpose(0, 2, 1, 3)
    att = jnp.einsum('bhtd,bhsd->bhts', q, k) * (1.0 / math.sqrt(hd))
    mask = jnp.tril(jnp.ones((T, T)))
    att = jnp.where(mask == 0, -jnp.inf, att)
    att = jax.nn.softmax(att, axis=-1)
    y = jnp.einsum('bhts,bhsd->bhtd', att, v).transpose(0, 2, 1, 3).reshape(B, T, C)
    x = x + lin(y, params['wp'], params['bp'])
    h2 = ln(x, params['ln2_g'], params['ln2_b'])
    u = jax.nn.gelu(lin(h2, params['w1'], params['b1']), approximate=False)
    return x + lin(u, params['w2'], params['b2'])


if __name__ == "__main__":
    B, T, C, n_head = 2, 8, 32, 4        # n_embd=32, n_head=4, T <= block_size
    key = jax.random.PRNGKey(0)
    kx, kp = jax.random.split(key)
    x = jax.random.normal(kx, (B, T, C), jnp.float32)
    params = init_params(kp, C)

    out = transformer_block(x, params, n_head)
    jax.block_until_ready(out)
    assert out.shape == (B, T, C)

    ref = reference_block(x, params, n_head)
    err = float(jnp.max(jnp.abs(out - ref)))
    # bf16 MXU operands + approx reciprocal -> slightly looser tolerance.
    if not err < 2e-3:
        raise AssertionError(f"mismatch vs reference, max abs err = {err}")

    print("KERNEL_OK")
</pallas_src>

<mosaic_0001>
module attributes {stable_mosaic.version = 11 : i64} {
  func.func @block_kernel(%arg0: i32, %arg1: memref<1x8x32xf32, #tpu.memory_space<vmem>>, %arg2: memref<1x32xf32, #tpu.memory_space<vmem>>, %arg3: memref<1x32xf32, #tpu.memory_space<vmem>>, %arg4: memref<32x96xbf16, #tpu.memory_space<vmem>>, %arg5: memref<1x96xf32, #tpu.memory_space<vmem>>, %arg6: memref<32x32xbf16, #tpu.memory_space<vmem>>, %arg7: memref<1x32xf32, #tpu.memory_space<vmem>>, %arg8: memref<1x32xf32, #tpu.memory_space<vmem>>, %arg9: memref<1x32xf32, #tpu.memory_space<vmem>>, %arg10: memref<32x128xbf16, #tpu.memory_space<vmem>>, %arg11: memref<1x128xf32, #tpu.memory_space<vmem>>, %arg12: memref<128x32xbf16, #tpu.memory_space<vmem>>, %arg13: memref<1x32xf32, #tpu.memory_space<vmem>>, %arg14: memref<1x8x32xf32, #tpu.memory_space<vmem>>, %arg15: memref<8x32xf32, #tpu.memory_space<vmem>>) attributes {dimension_semantics = [#tpu.dimension_semantics<parallel>], iteration_bounds = array<i64: 2>, scalar_prefetch = 0 : i64, scratch_operands = 1 : i64, tpu.core_type = #tpu.core_type<tc>, window_params = [{transform_indices = @transform_0, window_bounds = array<i64: 1, 8, 32>}, {pipeline_mode = #tpu.pipeline_mode<synchronous>, transform_indices = @transform_1, window_bounds = array<i64: 1, 32>}, {pipeline_mode = #tpu.pipeline_mode<synchronous>, transform_indices = @transform_2, window_bounds = array<i64: 1, 32>}, {pipeline_mode = #tpu.pipeline_mode<synchronous>, transform_indices = @transform_3, window_bounds = array<i64: 32, 96>}, {pipeline_mode = #tpu.pipeline_mode<synchronous>, transform_indices = @transform_4, window_bounds = array<i64: 1, 96>}, {pipeline_mode = #tpu.pipeline_mode<synchronous>, transform_indices = @transform_5, window_bounds = array<i64: 32, 32>}, {pipeline_mode = #tpu.pipeline_mode<synchronous>, transform_indices = @transform_6, window_bounds = array<i64: 1, 32>}, {pipeline_mode = #tpu.pipeline_mode<synchronous>, transform_indices = @transform_7, window_bounds = array<i64: 1, 32>}, {pipeline_mode = #tpu.pipeline_mode<synchronous>, transform_indices = @transform_8, window_bounds = array<i64: 1, 32>}, {pipeline_mode = #tpu.pipeline_mode<synchronous>, transform_indices = @transform_9, window_bounds = array<i64: 32, 128>}, {pipeline_mode = #tpu.pipeline_mode<synchronous>, transform_indices = @transform_10, window_bounds = array<i64: 1, 128>}, {pipeline_mode = #tpu.pipeline_mode<synchronous>, transform_indices = @transform_11, window_bounds = array<i64: 128, 32>}, {pipeline_mode = #tpu.pipeline_mode<synchronous>, transform_indices = @transform_12, window_bounds = array<i64: 1, 32>}, {transform_indices = @transform_13, window_bounds = array<i64: 1, 8, 32>}]} {
    %c0 = arith.constant 0 : index
    %c0_0 = arith.constant 0 : index
    %c0_1 = arith.constant 0 : index
    %0 = vector.load %arg1[%c0, %c0_0, %c0_1] : memref<1x8x32xf32, #tpu.memory_space<vmem>>, vector<1x8x32xf32>
    %1 = vector.shape_cast %0 : vector<1x8x32xf32> to vector<8x32xf32>
    %c0_2 = arith.constant 0 : index
    %c0_3 = arith.constant 0 : index
    %2 = vector.load %arg2[%c0_2, %c0_3] : memref<1x32xf32, #tpu.memory_space<vmem>>, vector<1x32xf32>
    %c0_4 = arith.constant 0 : index
    %c0_5 = arith.constant 0 : index
    %3 = vector.load %arg3[%c0_4, %c0_5] : memref<1x32xf32, #tpu.memory_space<vmem>>, vector<1x32xf32>
    %cst = arith.constant dense<0.000000e+00> : vector<8xf32>
    %4 = vector.multi_reduction <add>, %1, %cst [1] : vector<8x32xf32> to vector<8xf32>
    %5 = vector.shape_cast %4 : vector<8xf32> to vector<8x1xf32>
    %cst_6 = arith.constant 3.200000e+01 : f32
    %6 = vector.broadcast %cst_6 : f32 to vector<8x1xf32>
    %7 = arith.divf %5, %6 : vector<8x1xf32>
    %8 = vector.broadcast %7 : vector<8x1xf32> to vector<8x32xf32>
    %9 = arith.subf %1, %8 : vector<8x32xf32>
    %10 = arith.mulf %9, %9 : vector<8x32xf32>
    %cst_7 = arith.constant dense<0.000000e+00> : vector<8xf32>
    %11 = vector.multi_reduction <add>, %10, %cst_7 [1] : vector<8x32xf32> to vector<8xf32>
    %12 = vector.shape_cast %11 : vector<8xf32> to vector<8x1xf32>
    %cst_8 = arith.constant 3.200000e+01 : f32
    %13 = vector.broadcast %cst_8 : f32 to vector<8x1xf32>
    %14 = arith.divf %12, %13 : vector<8x1xf32>
    %15 = vector.broadcast %7 : vector<8x1xf32> to vector<8x32xf32>
    %16 = arith.subf %1, %15 : vector<8x32xf32>
    %cst_9 = arith.constant 9.99999974E-6 : f32
    %17 = vector.broadcast %cst_9 : f32 to vector<8x1xf32>
    %18 = arith.addf %14, %17 : vector<8x1xf32>
    %19 = math.rsqrt %18 : vector<8x1xf32>
    %20 = vector.broadcast %19 : vector<8x1xf32> to vector<8x32xf32>
    %21 = arith.mulf %16, %20 : vector<8x32xf32>
    %22 = vector.broadcast %2 : vector<1x32xf32> to vector<8x32xf32>
    %23 = arith.mulf %21, %22 : vector<8x32xf32>
    %24 = vector.broadcast %3 : vector<1x32xf32> to vector<8x32xf32>
    %25 = arith.addf %23, %24 : vector<8x32xf32>
    %26 = arith.truncf %25 : vector<8x32xf32> to vector<8x32xbf16>
    %c0_10 = arith.constant 0 : index
    %c0_11 = arith.constant 0 : index
    %27 = vector.load %arg4[%c0_10, %c0_11] : memref<32x96xbf16, #tpu.memory_space<vmem>>, vector<32x96xbf16>
    %cst_12 = arith.constant dense<0.000000e+00> : vector<8x96xf32>
    %28 = tpu.matmul %26, %27, %cst_12 {dimension_numbers = #tpu.dot_dimension_numbers<[1], [0], [0], [1], [0, 0, 1, 1], [], []>} : vector<8x32xbf16>, vector<32x96xbf16>, vector<8x96xf32> -> vector<8x96xf32>
    %c0_13 = arith.constant 0 : index
    %c0_14 = arith.constant 0 : index
    %29 = vector.load %arg5[%c0_13, %c0_14] : memref<1x96xf32, #tpu.memory_space<vmem>>, vector<1x96xf32>
    %30 = vector.broadcast %29 : vector<1x96xf32> to vector<8x96xf32>
    %31 = arith.addf %28, %30 : vector<8x96xf32>
    %32 = vector.extract_strided_slice %31 {offsets = [0, 0], sizes = [8, 32], strides = [1, 1]} : vector<8x96xf32> to vector<8x32xf32>
    %33 = arith.truncf %32 : vector<8x32xf32> to vector<8x32xbf16>
    %34 = vector.extract_strided_slice %31 {offsets = [0, 32], sizes = [8, 32], strides = [1, 1]} : vector<8x96xf32> to vector<8x32xf32>
    %35 = arith.truncf %34 : vector<8x32xf32> to vector<8x32xbf16>
    %36 = vector.extract_strided_slice %31 {offsets = [0, 64], sizes = [8, 32], strides = [1, 1]} : vector<8x96xf32> to vector<8x32xf32>
    %37 = arith.truncf %36 : vector<8x32xf32> to vector<8x32xbf16>
    %38 = tpu.iota {dimensions = array<i32: 0>} : vector<8x8xi32>
    %39 = tpu.iota {dimensions = array<i32: 1>} : vector<8x8xi32>
    %40 = arith.cmpi sge, %38, %39 : vector<8x8xi32>
    %41 = vector.extract_strided_slice %33 {offsets = [0, 0], sizes = [8, 8], strides = [1, 1]} : vector<8x32xbf16> to vector<8x8xbf16>
    %42 = vector.extract_strided_slice %35 {offsets = [0, 0], sizes = [8, 8], strides = [1, 1]} : vector<8x32xbf16> to vector<8x8xbf16>
    %43 = vector.extract_strided_slice %37 {offsets = [0, 0], sizes = [8, 8], strides = [1, 1]} : vector<8x32xbf16> to vector<8x8xbf16>
    %cst_15 = arith.constant dense<0.000000e+00> : vector<8x8xf32>
    %44 = tpu.matmul %41, %42, %cst_15 {dimension_numbers = #tpu.dot_dimension_numbers<[1], [1], [0], [0], [0, 0, 1, 0], [], []>} : vector<8x8xbf16>, vector<8x8xbf16>, vector<8x8xf32> -> vector<8x8xf32>
    %cst_16 = arith.constant 0.353553385 : f32
    %45 = vector.broadcast %cst_16 : f32 to vector<8x8xf32>
    %46 = arith.mulf %44, %45 : vector<8x8xf32>
    %cst_17 = arith.constant 0xFF800000 : f32
    %47 = vector.broadcast %cst_17 : f32 to vector<8x8xf32>
    %48 = arith.select %40, %46, %47 : vector<8x8xi1>, vector<8x8xf32>
    %cst_18 = arith.constant dense<0xFF800000> : vector<8xf32>
    %49 = vector.multi_reduction <maximumf>, %48, %cst_18 [1] : vector<8x8xf32> to vector<8xf32>
    %50 = vector.shape_cast %49 : vector<8xf32> to vector<8x1xf32>
    %51 = vector.broadcast %50 : vector<8x1xf32> to vector<8x8xf32>
    %52 = arith.subf %48, %51 : vector<8x8xf32>
    %53 = math.exp %52 : vector<8x8xf32>
    %cst_19 = arith.constant dense<0.000000e+00> : vector<8xf32>
    %54 = vector.multi_reduction <add>, %53, %cst_19 [1] : vector<8x8xf32> to vector<8xf32>
    %55 = vector.shape_cast %54 : vector<8xf32> to vector<8x1xf32>
    %56 = arith.truncf %53 : vector<8x8xf32> to vector<8x8xbf16>
    %cst_20 = arith.constant dense<0.000000e+00> : vector<8x8xf32>
    %57 = tpu.matmul %56, %43, %cst_20 {dimension_numbers = #tpu.dot_dimension_numbers<[1], [0], [0], [1], [0, 0, 1, 1], [], []>} : vector<8x8xbf16>, vector<8x8xbf16>, vector<8x8xf32> -> vector<8x8xf32>
    %58 = tpu.reciprocal %55 {approx = true} : vector<8x1xf32> -> vector<8x1xf32>
    %59 = vector.broadcast %58 : vector<8x1xf32> to vector<8x8xf32>
    %60 = arith.mulf %57, %59 : vector<8x8xf32>
    %c0_21 = arith.constant 0 : index
    %c0_22 = arith.constant 0 : index
    %61 = vector.load %arg15[%c0_21, %c0_22] : memref<8x32xf32, #tpu.memory_space<vmem>>, vector<8x8xf32>
    tpu.vector_store %arg15[%c0_21, %c0_22], %60 {strides = array<i32>} : memref<8x32xf32, #tpu.memory_space<vmem>>, vector<8x8xf32>,
    %62 = vector.extract_strided_slice %33 {offsets = [0, 8], sizes = [8, 8], strides = [1, 1]} : vector<8x32xbf16> to vector<8x8xbf16>
    %63 = vector.extract_strided_slice %35 {offsets = [0, 8], sizes = [8, 8], strides = [1, 1]} : vector<8x32xbf16> to vector<8x8xbf16>
    %64 = vector.extract_strided_slice %37 {offsets = [0, 8], sizes = [8, 8], strides = [1, 1]} : vector<8x32xbf16> to vector<8x8xbf16>
    %cst_23 = arith.constant dense<0.000000e+00> : vector<8x8xf32>
    %65 = tpu.matmul %62, %63, %cst_23 {dimension_numbers = #tpu.dot_dimension_numbers<[1], [1], [0], [0], [0, 0, 1, 0], [], []>} : vector<8x8xbf16>, vector<8x8xbf16>, vector<8x8xf32> -> vector<8x8xf32>
    %cst_24 = arith.constant 0.353553385 : f32
    %66 = vector.broadcast %cst_24 : f32 to vector<8x8xf32>
    %67 = arith.mulf %65, %66 : vector<8x8xf32>
    %cst_25 = arith.constant 0xFF800000 : f32
    %68 = vector.broadcast %cst_25 : f32 to vector<8x8xf32>
    %69 = arith.select %40, %67, %68 : vector<8x8xi1>, vector<8x8xf32>
    %cst_26 = arith.constant dense<0xFF800000> : vector<8xf32>
    %70 = vector.multi_reduction <maximumf>, %69, %cst_26 [1] : vector<8x8xf32> to vector<8xf32>
    %71 = vector.shape_cast %70 : vector<8xf32> to vector<8x1xf32>
    %72 = vector.broadcast %71 : vector<8x1xf32> to vector<8x8xf32>
    %73 = arith.subf %69, %72 : vector<8x8xf32>
    %74 = math.exp %73 : vector<8x8xf32>
    %cst_27 = arith.constant dense<0.000000e+00> : vector<8xf32>
    %75 = vector.multi_reduction <add>, %74, %cst_27 [1] : vector<8x8xf32> to vector<8xf32>
    %76 = vector.shape_cast %75 : vector<8xf32> to vector<8x1xf32>
    %77 = arith.truncf %74 : vector<8x8xf32> to vector<8x8xbf16>
    %cst_28 = arith.constant dense<0.000000e+00> : vector<8x8xf32>
    %78 = tpu.matmul %77, %64, %cst_28 {dimension_numbers = #tpu.dot_dimension_numbers<[1], [0], [0], [1], [0, 0, 1, 1], [], []>} : vector<8x8xbf16>, vector<8x8xbf16>, vector<8x8xf32> -> vector<8x8xf32>
    %79 = tpu.reciprocal %76 {approx = true} : vector<8x1xf32> -> vector<8x1xf32>
    %80 = vector.broadcast %79 : vector<8x1xf32> to vector<8x8xf32>
    %81 = arith.mulf %78, %80 : vector<8x8xf32>
    %c0_29 = arith.constant 0 : index
    %c8 = arith.constant 8 : index
    %82 = vector.load %arg15[%c0_29, %c8] : memref<8x32xf32, #tpu.memory_space<vmem>>, vector<8x8xf32>
    tpu.vector_store %arg15[%c0_29, %c8], %81 {strides = array<i32>} : memref<8x32xf32, #tpu.memory_space<vmem>>, vector<8x8xf32>,
    %83 = vector.extract_strided_slice %33 {offsets = [0, 16], sizes = [8, 8], strides = [1, 1]} : vector<8x32xbf16> to vector<8x8xbf16>
    %84 = vector.extract_strided_slice %35 {offsets = [0, 16], sizes = [8, 8], strides = [1, 1]} : vector<8x32xbf16> to vector<8x8xbf16>
    %85 = vector.extract_strided_slice %37 {offsets = [0, 16], sizes = [8, 8], strides = [1, 1]} : vector<8x32xbf16> to vector<8x8xbf16>
    %cst_30 = arith.constant dense<0.000000e+00> : vector<8x8xf32>
    %86 = tpu.matmul %83, %84, %cst_30 {dimension_numbers = #tpu.dot_dimension_numbers<[1], [1], [0], [0], [0, 0, 1, 0], [], []>} : vector<8x8xbf16>, vector<8x8xbf16>, vector<8x8xf32> -> vector<8x8xf32>
    %cst_31 = arith.constant 0.353553385 : f32
    %87 = vector.broadcast %cst_31 : f32 to vector<8x8xf32>
    %88 = arith.mulf %86, %87 : vector<8x8xf32>
    %cst_32 = arith.constant 0xFF800000 : f32
    %89 = vector.broadcast %cst_32 : f32 to vector<8x8xf32>
    %90 = arith.select %40, %88, %89 : vector<8x8xi1>, vector<8x8xf32>
    %cst_33 = arith.constant dense<0xFF800000> : vector<8xf32>
    %91 = vector.multi_reduction <maximumf>, %90, %cst_33 [1] : vector<8x8xf32> to vector<8xf32>
    %92 = vector.shape_cast %91 : vector<8xf32> to vector<8x1xf32>
    %93 = vector.broadcast %92 : vector<8x1xf32> to vector<8x8xf32>
    %94 = arith.subf %90, %93 : vector<8x8xf32>
    %95 = math.exp %94 : vector<8x8xf32>
    %cst_34 = arith.constant dense<0.000000e+00> : vector<8xf32>
    %96 = vector.multi_reduction <add>, %95, %cst_34 [1] : vector<8x8xf32> to vector<8xf32>
    %97 = vector.shape_cast %96 : vector<8xf32> to vector<8x1xf32>
    %98 = arith.truncf %95 : vector<8x8xf32> to vector<8x8xbf16>
    %cst_35 = arith.constant dense<0.000000e+00> : vector<8x8xf32>
    %99 = tpu.matmul %98, %85, %cst_35 {dimension_numbers = #tpu.dot_dimension_numbers<[1], [0], [0], [1], [0, 0, 1, 1], [], []>} : vector<8x8xbf16>, vector<8x8xbf16>, vector<8x8xf32> -> vector<8x8xf32>
    %100 = tpu.reciprocal %97 {approx = true} : vector<8x1xf32> -> vector<8x1xf32>
    %101 = vector.broadcast %100 : vector<8x1xf32> to vector<8x8xf32>
    %102 = arith.mulf %99, %101 : vector<8x8xf32>
    %c0_36 = arith.constant 0 : index
    %c16 = arith.constant 16 : index
    %103 = vector.load %arg15[%c0_36, %c16] : memref<8x32xf32, #tpu.memory_space<vmem>>, vector<8x8xf32>
    tpu.vector_store %arg15[%c0_36, %c16], %102 {strides = array<i32>} : memref<8x32xf32, #tpu.memory_space<vmem>>, vector<8x8xf32>,
    %104 = vector.extract_strided_slice %33 {offsets = [0, 24], sizes = [8, 8], strides = [1, 1]} : vector<8x32xbf16> to vector<8x8xbf16>
    %105 = vector.extract_strided_slice %35 {offsets = [0, 24], sizes = [8, 8], strides = [1, 1]} : vector<8x32xbf16> to vector<8x8xbf16>
    %106 = vector.extract_strided_slice %37 {offsets = [0, 24], sizes = [8, 8], strides = [1, 1]} : vector<8x32xbf16> to vector<8x8xbf16>
    %cst_37 = arith.constant dense<0.000000e+00> : vector<8x8xf32>
    %107 = tpu.matmul %104, %105, %cst_37 {dimension_numbers = #tpu.dot_dimension_numbers<[1], [1], [0], [0], [0, 0, 1, 0], [], []>} : vector<8x8xbf16>, vector<8x8xbf16>, vector<8x8xf32> -> vector<8x8xf32>
    %cst_38 = arith.constant 0.353553385 : f32
    %108 = vector.broadcast %cst_38 : f32 to vector<8x8xf32>
    %109 = arith.mulf %107, %108 : vector<8x8xf32>
    %cst_39 = arith.constant 0xFF800000 : f32
    %110 = vector.broadcast %cst_39 : f32 to vector<8x8xf32>
    %111 = arith.select %40, %109, %110 : vector<8x8xi1>, vector<8x8xf32>
    %cst_40 = arith.constant dense<0xFF800000> : vector<8xf32>
    %112 = vector.multi_reduction <maximumf>, %111, %cst_40 [1] : vector<8x8xf32> to vector<8xf32>
    %113 = vector.shape_cast %112 : vector<8xf32> to vector<8x1xf32>
    %114 = vector.broadcast %113 : vector<8x1xf32> to vector<8x8xf32>
    %115 = arith.subf %111, %114 : vector<8x8xf32>
    %116 = math.exp %115 : vector<8x8xf32>
    %cst_41 = arith.constant dense<0.000000e+00> : vector<8xf32>
    %117 = vector.multi_reduction <add>, %116, %cst_41 [1] : vector<8x8xf32> to vector<8xf32>
    %118 = vector.shape_cast %117 : vector<8xf32> to vector<8x1xf32>
    %119 = arith.truncf %116 : vector<8x8xf32> to vector<8x8xbf16>
    %cst_42 = arith.constant dense<0.000000e+00> : vector<8x8xf32>
    %120 = tpu.matmul %119, %106, %cst_42 {dimension_numbers = #tpu.dot_dimension_numbers<[1], [0], [0], [1], [0, 0, 1, 1], [], []>} : vector<8x8xbf16>, vector<8x8xbf16>, vector<8x8xf32> -> vector<8x8xf32>
    %121 = tpu.reciprocal %118 {approx = true} : vector<8x1xf32> -> vector<8x1xf32>
    %122 = vector.broadcast %121 : vector<8x1xf32> to vector<8x8xf32>
    %123 = arith.mulf %120, %122 : vector<8x8xf32>
    %c0_43 = arith.constant 0 : index
    %c24 = arith.constant 24 : index
    %124 = vector.load %arg15[%c0_43, %c24] : memref<8x32xf32, #tpu.memory_space<vmem>>, vector<8x8xf32>
    tpu.vector_store %arg15[%c0_43, %c24], %123 {strides = array<i32>} : memref<8x32xf32, #tpu.memory_space<vmem>>, vector<8x8xf32>,
    %c0_44 = arith.constant 0 : index
    %c0_45 = arith.constant 0 : index
    %125 = vector.load %arg15[%c0_44, %c0_45] : memref<8x32xf32, #tpu.memory_space<vmem>>, vector<8x32xf32>
    %126 = arith.truncf %125 : vector<8x32xf32> to vector<8x32xbf16>
    %c0_46 = arith.constant 0 : index
    %c0_47 = arith.constant 0 : index
    %127 = vector.load %arg6[%c0_46, %c0_47] : memref<32x32xbf16, #tpu.memory_space<vmem>>, vector<32x32xbf16>
    %cst_48 = arith.constant dense<0.000000e+00> : vector<8x32xf32>
    %128 = tpu.matmul %126, %127, %cst_48 {dimension_numbers = #tpu.dot_dimension_numbers<[1], [0], [0], [1], [0, 0, 1, 1], [], []>} : vector<8x32xbf16>, vector<32x32xbf16>, vector<8x32xf32> -> vector<8x32xf32>
    %c0_49 = arith.constant 0 : index
    %c0_50 = arith.constant 0 : index
    %129 = vector.load %arg7[%c0_49, %c0_50] : memref<1x32xf32, #tpu.memory_space<vmem>>, vector<1x32xf32>
    %130 = vector.broadcast %129 : vector<1x32xf32> to vector<8x32xf32>
    %131 = arith.addf %128, %130 : vector<8x32xf32>
    %132 = arith.addf %1, %131 : vector<8x32xf32>
    %c0_51 = arith.constant 0 : index
    %c0_52 = arith.constant 0 : index
    %133 = vector.load %arg8[%c0_51, %c0_52] : memref<1x32xf32, #tpu.memory_space<vmem>>, vector<1x32xf32>
    %c0_53 = arith.constant 0 : index
    %c0_54 = arith.constant 0 : index
    %134 = vector.load %arg9[%c0_53, %c0_54] : memref<1x32xf32, #tpu.memory_space<vmem>>, vector<1x32xf32>
    %cst_55 = arith.constant dense<0.000000e+00> : vector<8xf32>
    %135 = vector.multi_reduction <add>, %132, %cst_55 [1] : vector<8x32xf32> to vector<8xf32>
    %136 = vector.shape_cast %135 : vector<8xf32> to vector<8x1xf32>
    %cst_56 = arith.constant 3.200000e+01 : f32
    %137 = vector.broadcast %cst_56 : f32 to vector<8x1xf32>
    %138 = arith.divf %136, %137 : vector<8x1xf32>
    %139 = vector.broadcast %138 : vector<8x1xf32> to vector<8x32xf32>
    %140 = arith.subf %132, %139 : vector<8x32xf32>
    %141 = arith.mulf %140, %140 : vector<8x32xf32>
    %cst_57 = arith.constant dense<0.000000e+00> : vector<8xf32>
    %142 = vector.multi_reduction <add>, %141, %cst_57 [1] : vector<8x32xf32> to vector<8xf32>
    %143 = vector.shape_cast %142 : vector<8xf32> to vector<8x1xf32>
    %cst_58 = arith.constant 3.200000e+01 : f32
    %144 = vector.broadcast %cst_58 : f32 to vector<8x1xf32>
    %145 = arith.divf %143, %144 : vector<8x1xf32>
    %146 = vector.broadcast %138 : vector<8x1xf32> to vector<8x32xf32>
    %147 = arith.subf %132, %146 : vector<8x32xf32>
    %cst_59 = arith.constant 9.99999974E-6 : f32
    %148 = vector.broadcast %cst_59 : f32 to vector<8x1xf32>
    %149 = arith.addf %145, %148 : vector<8x1xf32>
    %150 = math.rsqrt %149 : vector<8x1xf32>
    %151 = vector.broadcast %150 : vector<8x1xf32> to vector<8x32xf32>
    %152 = arith.mulf %147, %151 : vector<8x32xf32>
    %153 = vector.broadcast %133 : vector<1x32xf32> to vector<8x32xf32>
    %154 = arith.mulf %152, %153 : vector<8x32xf32>
    %155 = vector.broadcast %134 : vector<1x32xf32> to vector<8x32xf32>
    %156 = arith.addf %154, %155 : vector<8x32xf32>
    %157 = arith.truncf %156 : vector<8x32xf32> to vector<8x32xbf16>
    %c0_60 = arith.constant 0 : index
    %c0_61 = arith.constant 0 : index
    %158 = vector.load %arg10[%c0_60, %c0_61] : memref<32x128xbf16, #tpu.memory_space<vmem>>, vector<32x128xbf16>
    %cst_62 = arith.constant dense<0.000000e+00> : vector<8x128xf32>
    %159 = tpu.matmul %157, %158, %cst_62 {dimension_numbers = #tpu.dot_dimension_numbers<[1], [0], [0], [1], [0, 0, 1, 1], [], []>} : vector<8x32xbf16>, vector<32x128xbf16>, vector<8x128xf32> -> vector<8x128xf32>
    %c0_63 = arith.constant 0 : index
    %c0_64 = arith.constant 0 : index
    %160 = vector.load %arg11[%c0_63, %c0_64] : memref<1x128xf32, #tpu.memory_space<vmem>>, vector<1x128xf32>
    %161 = vector.broadcast %160 : vector<1x128xf32> to vector<8x128xf32>
    %162 = arith.addf %159, %161 : vector<8x128xf32>
    %cst_65 = arith.constant 5.000000e-01 : f32
    %163 = vector.broadcast %cst_65 : f32 to vector<8x128xf32>
    %164 = arith.mulf %163, %162 : vector<8x128xf32>
    %cst_66 = arith.constant 0.707106769 : f32
    %165 = vector.broadcast %cst_66 : f32 to vector<8x128xf32>
    %166 = arith.mulf %162, %165 : vector<8x128xf32>
    %cst_67 = arith.constant 0.000000e+00 : f32
    %167 = vector.broadcast %cst_67 : f32 to vector<8x128xf32>
    %168 = arith.cmpf oge, %166, %167 : vector<8x128xf32>
    %cst_68 = arith.constant 1.000000e+00 : f32
    %cst_69 = arith.constant -1.000000e+00 : f32
    %169 = vector.broadcast %cst_68 : f32 to vector<8x128xf32>
    %170 = vector.broadcast %cst_69 : f32 to vector<8x128xf32>
    %171 = arith.select %168, %169, %170 : vector<8x128xi1>, vector<8x128xf32>
    %172 = math.absf %166 : vector<8x128xf32>
    %cst_70 = arith.constant 0.327591091 : f32
    %173 = vector.broadcast %cst_70 : f32 to vector<8x128xf32>
    %174 = arith.mulf %173, %172 : vector<8x128xf32>
    %cst_71 = arith.constant 1.000000e+00 : f32
    %175 = vector.broadcast %cst_71 : f32 to vector<8x128xf32>
    %176 = arith.addf %175, %174 : vector<8x128xf32>
    %cst_72 = arith.constant 1.000000e+00 : f32
    %177 = vector.broadcast %cst_72 : f32 to vector<8x128xf32>
    %178 = arith.divf %177, %176 : vector<8x128xf32>
    %cst_73 = arith.constant 1.06140542 : f32
    %179 = vector.broadcast %cst_73 : f32 to vector<8x128xf32>
    %180 = arith.mulf %179, %178 : vector<8x128xf32>
    %cst_74 = arith.constant -1.45315206 : f32
    %181 = vector.broadcast %cst_74 : f32 to vector<8x128xf32>
    %182 = arith.addf %180, %181 : vector<8x128xf32>
    %183 = arith.mulf %182, %178 : vector<8x128xf32>
    %cst_75 = arith.constant 1.42141378 : f32
    %184 = vector.broadcast %cst_75 : f32 to vector<8x128xf32>
    %185 = arith.addf %183, %184 : vector<8x128xf32>
    %186 = arith.mulf %185, %178 : vector<8x128xf32>
    %cst_76 = arith.constant -0.284496725 : f32
    %187 = vector.broadcast %cst_76 : f32 to vector<8x128xf32>
    %188 = arith.addf %186, %187 : vector<8x128xf32>
    %189 = arith.mulf %188, %178 : vector<8x128xf32>
    %cst_77 = arith.constant 0.254829586 : f32
    %190 = vector.broadcast %cst_77 : f32 to vector<8x128xf32>
    %191 = arith.addf %189, %190 : vector<8x128xf32>
    %192 = arith.mulf %191, %178 : vector<8x128xf32>
    %cst_78 = arith.constant 0.000000e+00 : f32
    %193 = vector.broadcast %cst_78 : f32 to vector<8x128xf32>
    %194 = arith.subf %193, %172 : vector<8x128xf32>
    %195 = arith.mulf %194, %172 : vector<8x128xf32>
    %196 = math.exp %195 : vector<8x128xf32>
    %197 = arith.mulf %192, %196 : vector<8x128xf32>
    %cst_79 = arith.constant 1.000000e+00 : f32
    %198 = vector.broadcast %cst_79 : f32 to vector<8x128xf32>
    %199 = arith.subf %198, %197 : vector<8x128xf32>
    %200 = arith.mulf %171, %199 : vector<8x128xf32>
    %cst_80 = arith.constant 1.000000e+00 : f32
    %201 = vector.broadcast %cst_80 : f32 to vector<8x128xf32>
    %202 = arith.addf %201, %200 : vector<8x128xf32>
    %203 = arith.mulf %164, %202 : vector<8x128xf32>
    %204 = arith.truncf %203 : vector<8x128xf32> to vector<8x128xbf16>
    %c0_81 = arith.constant 0 : index
    %c0_82 = arith.constant 0 : index
    %205 = vector.load %arg12[%c0_81, %c0_82] : memref<128x32xbf16, #tpu.memory_space<vmem>>, vector<128x32xbf16>
    %cst_83 = arith.constant dense<0.000000e+00> : vector<8x32xf32>
    %206 = tpu.matmul %204, %205, %cst_83 {dimension_numbers = #tpu.dot_dimension_numbers<[1], [0], [0], [1], [0, 0, 1, 1], [], []>} : vector<8x128xbf16>, vector<128x32xbf16>, vector<8x32xf32> -> vector<8x32xf32>
    %c0_84 = arith.constant 0 : index
    %c0_85 = arith.constant 0 : index
    %207 = vector.load %arg13[%c0_84, %c0_85] : memref<1x32xf32, #tpu.memory_space<vmem>>, vector<1x32xf32>
    %208 = vector.broadcast %207 : vector<1x32xf32> to vector<8x32xf32>
    %209 = arith.addf %206, %208 : vector<8x32xf32>
    %210 = arith.addf %132, %209 : vector<8x32xf32>
    %c0_86 = arith.constant 0 : index
    %c0_87 = arith.constant 0 : index
    %c0_88 = arith.constant 0 : index
    %211 = vector.load %arg14[%c0_86, %c0_87, %c0_88] : memref<1x8x32xf32, #tpu.memory_space<vmem>>, vector<1x8x32xf32>
    %212 = vector.shape_cast %211 : vector<1x8x32xf32> to vector<8x32xf32>
    %213 = vector.shape_cast %210 : vector<8x32xf32> to vector<1x8x32xf32>
    tpu.vector_store %arg14[%c0_86, %c0_87, %c0_88], %213 {strides = array<i32>} : memref<1x8x32xf32, #tpu.memory_space<vmem>>, vector<1x8x32xf32>,
    return
  }
  func.func @transform_0(%arg0: i32) -> (i32, i32, i32) {
    %c0_i32 = arith.constant 0 : i32
    %c0_i32_0 = arith.constant 0 : i32
    %c0_i32_1 = arith.constant 0 : i32
    return %arg0, %c0_i32, %c0_i32_0 : i32, i32, i32
  }
  func.func @transform_1(%arg0: i32) -> (i32, i32) {
    %c0_i32 = arith.constant 0 : i32
    %c0_i32_0 = arith.constant 0 : i32
    %c0_i32_1 = arith.constant 0 : i32
    return %c0_i32, %c0_i32_0 : i32, i32
  }
  func.func @transform_2(%arg0: i32) -> (i32, i32) {
    %c0_i32 = arith.constant 0 : i32
    %c0_i32_0 = arith.constant 0 : i32
    %c0_i32_1 = arith.constant 0 : i32
    return %c0_i32, %c0_i32_0 : i32, i32
  }
  func.func @transform_3(%arg0: i32) -> (i32, i32) {
    %c0_i32 = arith.constant 0 : i32
    %c0_i32_0 = arith.constant 0 : i32
    %c0_i32_1 = arith.constant 0 : i32
    return %c0_i32, %c0_i32_0 : i32, i32
  }
  func.func @transform_4(%arg0: i32) -> (i32, i32) {
    %c0_i32 = arith.constant 0 : i32
    %c0_i32_0 = arith.constant 0 : i32
    %c0_i32_1 = arith.constant 0 : i32
    return %c0_i32, %c0_i32_0 : i32, i32
  }
  func.func @transform_5(%arg0: i32) -> (i32, i32) {
    %c0_i32 = arith.constant 0 : i32
    %c0_i32_0 = arith.constant 0 : i32
    %c0_i32_1 = arith.constant 0 : i32
    return %c0_i32, %c0_i32_0 : i32, i32
  }
  func.func @transform_6(%arg0: i32) -> (i32, i32) {
    %c0_i32 = arith.constant 0 : i32
    %c0_i32_0 = arith.constant 0 : i32
    %c0_i32_1 = arith.constant 0 : i32
    return %c0_i32, %c0_i32_0 : i32, i32
  }
  func.func @transform_7(%arg0: i32) -> (i32, i32) {
    %c0_i32 = arith.constant 0 : i32
    %c0_i32_0 = arith.constant 0 : i32
    %c0_i32_1 = arith.constant 0 : i32
    return %c0_i32, %c0_i32_0 : i32, i32
  }
  func.func @transform_8(%arg0: i32) -> (i32, i32) {
    %c0_i32 = arith.constant 0 : i32
    %c0_i32_0 = arith.constant 0 : i32
    %c0_i32_1 = arith.constant 0 : i32
    return %c0_i32, %c0_i32_0 : i32, i32
  }
  func.func @transform_9(%arg0: i32) -> (i32, i32) {
    %c0_i32 = arith.constant 0 : i32
    %c0_i32_0 = arith.constant 0 : i32
    %c0_i32_1 = arith.constant 0 : i32
    return %c0_i32, %c0_i32_0 : i32, i32
  }
  func.func @transform_10(%arg0: i32) -> (i32, i32) {
    %c0_i32 = arith.constant 0 : i32
    %c0_i32_0 = arith.constant 0 : i32
    %c0_i32_1 = arith.constant 0 : i32
    return %c0_i32, %c0_i32_0 : i32, i32
  }
  func.func @transform_11(%arg0: i32) -> (i32, i32) {
    %c0_i32 = arith.constant 0 : i32
    %c0_i32_0 = arith.constant 0 : i32
    %c0_i32_1 = arith.constant 0 : i32
    return %c0_i32, %c0_i32_0 : i32, i32
  }
  func.func @transform_12(%arg0: i32) -> (i32, i32) {
    %c0_i32 = arith.constant 0 : i32
    %c0_i32_0 = arith.constant 0 : i32
    %c0_i32_1 = arith.constant 0 : i32
    return %c0_i32, %c0_i32_0 : i32, i32
  }
  func.func @transform_13(%arg0: i32) -> (i32, i32, i32) {
    %c0_i32 = arith.constant 0 : i32
    %c0_i32_0 = arith.constant 0 : i32
    %c0_i32_1 = arith.constant 0 : i32
    return %arg0, %c0_i32, %c0_i32_0 : i32, i32, i32
  }
}

</mosaic_0001>

<bundles_post_ra>
// kernel: tpu_custom_call.1
= control target key start
LH: loop header
LB: loop body
LE: loop exit
PB: predicated region body
PF: predicated region fallthrough
CT: control target
= control target key end

     0   :  { %s2077_s0 = inlined_call_operand.vmem [shape: f32[2,8,32], index: 0, kind: input, shape index: {}]   ;;  %s2078_s1 = inlined_call_operand.vmem [shape: f32[1,32], index: 1, kind: input, shape index: {}]   ;;  %s2079_s2 = inlined_call_operand.vmem [shape: f32[1,32], index: 2, kind: input, shape index: {}]   ;;  %s2080_s3 = inlined_call_operand.vmem [shape: bf16[32,96], index: 3, kind: input, shape index: {}]   ;;  %s2081_s4 = inlined_call_operand.vmem [shape: f32[1,96], index: 4, kind: input, shape index: {}]   ;;  %s2082_s5 = inlined_call_operand.vmem [shape: bf16[32,32], index: 5, kind: input, shape index: {}]   ;;  %s2083_s6 = inlined_call_operand.vmem [shape: f32[1,32], index: 6, kind: input, shape index: {}]   ;;  %s2084_s7 = inlined_call_operand.vmem [shape: f32[1,32], index: 7, kind: input, shape index: {}]   ;;  %s2085_s8 = inlined_call_operand.vmem [shape: f32[1,32], index: 8, kind: input, shape index: {}]   ;;  %s2086_s9 = inlined_call_operand.vmem [shape: bf16[32,128], index: 9, kind: input, shape index: {}]   ;;  %s2087_s10 = inlined_call_operand.vmem [shape: f32[1,128], index: 10, kind: input, shape index: {}]   ;;  %s2088_s11 = inlined_call_operand.vmem [shape: bf16[128,32], index: 11, kind: input, shape index: {}]   ;;  %s2089_s12 = inlined_call_operand.vmem [shape: f32[1,32], index: 12, kind: input, shape index: {}]   ;;  %s2090_s13 = inlined_call_operand.hbm [shape: f32[2,8,32], index: 13, kind: output, shape index: {}]  }
   0x1   :  { %2091 = sst [smem:[#allocation6_spill]] %s2077_s0 }
   0x2   :  { %2092 = sst [smem:[#allocation7_spill]] %s2078_s1 }
   0x3   :  { %2093 = sst [smem:[#allocation8_spill]] %s2079_s2 }
   0x4   :  { %18 = vsyncpa [#allocation4], 0 }
   0x5   :  { %20 = vsyncpa [#allocation4 + $0x1], 0  ;;  %s1804_s25 = smov 0   ;;  %s1806_s26 = smov 0  }
   0x6   :  { %s1808_s27 = smov 0   ;;  %s1810_s28 = smov 0  }
   0x7 LB: > { %s1825_s29 = sadd.s32 4294967295, %s1714_s28   ;;  %s1389_s30 = sadd.s32 4294967294, %s1714_s28   ;;  %s1714_s28 = sphi %s1810_s28, %s2102_s28   ;;  %s1710_s27 = sphi %s1808_s27, %s2101_s27   ;;  %s1706_s26 = sphi %s1806_s26, %s2100_s26   ;;  %s1702_s25 = sphi %s1804_s25, %s2099_s25  }
   0x8   : > { %s1829_s14 = sadd.s32 1, %s1714_s28   ;;  %s311_s15 = sadd.s32 1, %s1710_s27 }
   0x9   : > { %s308_s16 = ssub.s32 %s1714_s28, %s1829_s14  ;;  %p321_p0 = scmp.ne.s32.totalorder %s1710_s27, %s1706_s26 }
   0xa   : > { %p309_p1 = scmp.eq.s32.totalorder %s308_s16, 0  ;;  %p322_p2 = scmp.eq.s32.totalorder %s1825_s29, 1 }
   0xb   : > { %p327_p3 = scmp.ne.s32.totalorder %s1706_s26, %s1702_s25  ;;  %p328_p4 = scmp.eq.s32.totalorder %s1389_s30, 1 }
   0xc   : > { %s1840_s17 = scalar_select %p309_p1, %s1710_s27, %s311_s15  }
   0xd   : > { %p1842_p5 = por %p322_p2, %p321_p0  ;;  %p1846_p6 = por %p328_p4, %p327_p3 }
   0xe   : > { %p1392_p7 = scmp.ge.s32.totalorder %s1714_s28, 1  ;;  %p389_p8 = scmp.lt.s32.totalorder %s1714_s28, 3 }
  0x10   : > { %p390_p9 = pnand %p1392_p7, %p389_p8 }
  0x11   : > { %p432_p10 = scmp.lt.s32.totalorder (!%p390_p9), %s1825_s29, 1  ;;  %vm440_vm0 = vcmask (!%p390_p9), 261120   ;;  %s2096_s0 = sld [smem:[#allocation6_spill]] (!%p390_p9)  ;;  %v1614_v7 = vld [vmem:[%s2080_s3] sm:$0xff] (!%p390_p9)   ;;  %v1716_v8 = vmov (!%p390_p9), 0.0   ;;  %vm1717_vm1 = vmmov (!%p390_p9), 0   ;;  %v537_v38 = vlaneseq (!%p390_p9) }
  0x12   : > { %393 = sbr.rel (%p390_p9) target bundleno = 2483 (0x9b3), region = 72  ;;  %1466 = vmatprep.subr.bf16.mxu0 (!%p390_p9), %v1716_v8  ;;  %1470 = vmatprep.mubr.msk.bf16.mxu0 (!%p390_p9), %vm1717_vm1, %v1716_v8  ;;  %v1615_v9 = vld [vmem:[%s2080_s3 + $0x8] sm:$0xff] (!%p390_p9)   ;;  %s2097_s1 = sld [smem:[#allocation7_spill]] (!%p390_p9)  ;;  %v1397_v20 = vld [vmem:[%s2081_s4] ss:$0 sm:$0xff] (!%p390_p9)  ;;  %vm545_vm2 = vcmask (!%p390_p9), 64512  }
  0x13   : > { %1467 = vmatpush3.bf16.msra.mxu0 (!%p390_p9), %v1614_v7  ;;  %1486 = vmatprep.subr.bf16.mxu1 (!%p390_p9), %v1716_v8  ;;  %s2098_s2 = sld [smem:[#allocation8_spill]] (!%p390_p9)  ;;  %s1718_s16 = smov (!%p390_p9), 120   ;;  %v538_v39 = vshrl.u32 (!%p390_p9), %v537_v38, 7  ;;  %v540_v40 = vand.u32 (!%p390_p9), 127, %v537_v38  ;;  %vm609_vm4 = vcmask (!%p390_p9), 1043456   ;;  %vm772_vm5 = vcmask (!%p390_p9), 130112  }
  0x14   : > { %1468 = vmatprep.subr.bf16.mxu0 (!%p390_p9), %v1716_v8  ;;  %1488 = vmatprep.mubr.msk.bf16.mxu1 (!%p390_p9), %vm1717_vm1, %v1716_v8  ;;  %s1721_s22 = smov (!%p390_p9), 80   ;;  %s1722_s23 = smov (!%p390_p9), 112   ;;  %vm890_vm6 = vcmask (!%p390_p9), 195712   ;;  %vm1008_vm7 = vcmask (!%p390_p9), 261312  }
  0x15   : > { %s1724_s30 = smov (!%p390_p9), 104   ;;  %vm541_vm3 = vcmp.ge.s32.totalorder (!%p390_p9), %v538_v39, %v540_v40  ;;  %s1725_s15 = smov (!%p390_p9), 64  }
  0x17   : > { %1469 = vmatpush3.bf16.msra.mxu0 (!%p390_p9), %v1615_v9 }
  0x18   : > { %1474 = vmatprep.subr.bf16.mxu0 (!%p390_p9), %v1716_v8  ;;  %v1395_v14 = vld [vmem:[%s2097_s1] ss:$0 sm:$0xff] (!%p390_p9) }
  0x19   : > { %s433_s20 = scalar_select %p432_p10, %s1825_s29, 1  ;;  %v1396_v16 = vld [vmem:[%s2098_s2] ss:$0 sm:$0xff] }
  0x1b   : > { %s1394_s21 = sshll.u32 %s433_s20, 3  ;;  %s1719_s20 = smov 96  }
  0x1c   : > { %s435_s24 = scalar_lea.vmem %s2096_s0, %s1394_s21  ;;  %s1720_s21 = smov 88  }
  0x1d   : > { %v1857_v0 = vld [vmem:[%s435_s24] sm:$0xff]  ;;  %s1723_s24 = smov 72  }
  0x1e   : > { %v441_v1 = vsel %vm440_vm0, %v1857_v0, 0.0 }
  0x1f   : > { %442 = vadd.xlane.f32.xlu0 %v441_v1 }
  0xac   : > { %v443_v2 = vpop.xlane.xlu0 %442 }
  0xad   : > { %v445_v3 = vmul.f32 0.03125, %v443_v2 }
  0xaf   : > { %v446_v4 = vsub.f32 %v1857_v0, %v445_v3 }
  0xb1   : > { %v447_v5 = vmul.f32 %v446_v4, %v446_v4 }
  0xb3   : > { %v448_v6 = vsel %vm440_vm0, %v447_v5, 0.0 }
  0xb4   : > { %449 = vadd.xlane.f32.xlu0 %v448_v6 }
 0x141   : > { %v450_v10 = vpop.xlane.xlu0 %449 }
 0x142   : > { %v451_v11 = vmul.f32 0.03125, %v450_v10 }
 0x144   : > { %v452_v12 = vadd.f32 1e-05, %v451_v11 }
 0x146   : > { %1628 = vrsqrt.f32 %v452_v12 }
 0x150   : > { %v1629_v13 = vpop.eup %1628 }
 0x151   : > { %v454_v15 = vmul.f32 %v1629_v13, %v446_v4 }
 0x153   : > { %v461_v17 = vmul.f32 %v1395_v14, %v454_v15 }
 0x155   : > { %v468_v18 = vadd.f32 %v1396_v16, %v461_v17 }
 0x157   : > { %v469_v19 = vpack.c.bf16 %v468_v18, %v468_v18 }
 0x159   : > { %1471 = vmatmul.mubr.msk.bf16.vlgmr.msra.gmra.mrb[0].mxu0 %vm440_vm0, %v469_v19 }
 0x15a   : > { %1476 = vmatprep.mubr.msk.bf16.mxu0 %vm1717_vm1, %v1716_v8 }
 0x22c   : > { %v530_v21 = vpop.f32.mrb[0].mxu0 }
 0x22d   : > { %v531_v22 = vadd.f32 %v1397_v20, %v530_v21  ;;  %v1472_v23 = vpop.f32.mrb[1].mxu0 }
 0x22e   : > { %v533_v24 = vpop.f32.mrb[2].mxu0 }
 0x22f   : > { %v1889_v25 = vpack.c.bf16 %v531_v22, %v531_v22  ;;  %v1473_v26 = vpop.f32.mrb[3].mxu0 }
 0x231   : > { %656 = vrot.lane.b32.xlu0 %v1889_v25, %s1718_s16  ;;  %543 = vrot.lane.b32.xlu1 %v1889_v25, %s1719_s20  ;;  %s1726_s16 = smov 56   ;;  %s1727_s20 = smov 48  }
 0x235   : > { %658 = vrot.lane.b32.xlu1 %v1889_v25, %s1720_s21  ;;  %s1728_s21 = smov 40  }
 0x239   : > { %776 = vrot.lane.b32.xlu1 %v1889_v25, %s1721_s22  ;;  %s1729_s22 = smov 8  }
 0x23d   : > { %774 = vrot.lane.b32.xlu1 %v1889_v25, %s1722_s23 }
 0x241   : > { %894 = vrot.lane.b32.xlu1 %v1889_v25, %s1723_s24 }
 0x245   : > { %892 = vrot.lane.b32.xlu1 %v1889_v25, %s1724_s30  ;;  %s429_s30 = sand.u32 1, %s1706_s26  }
 0x2a3   : > { %v544_v27 = vpop.permute.xlu1 %543  ;;  %v657_v32 = vpop.permute.xlu0 %656 }
 0x2a4   : > { %v550_v28 = vsel %vm545_vm2, %v544_v27, 0 }
 0x2a5   : > { %1475 = vmatpush3.bf16.xpose.msra.mxu0 %v550_v28 }
 0x2a6   : > { %1480 = vmatprep.subr.bf16.mxu0 %v1716_v8 }
 0x2a7   : > { %v659_v29 = vpop.permute.xlu1 %658 }
 0x2a8   : > { %v664_v30 = vsel %vm545_vm2, %v659_v29, 0 }
 0x2a9   : > { %1487 = vmatpush3.bf16.xpose.msra.mxu1 %v664_v30 }
 0x2aa   : > { %1498 = vmatprep.subr.bf16.mxu1 %v1716_v8 }
 0x2ab   : > { %v777_v31 = vpop.permute.xlu1 %776 }
 0x2ac   : > { %1477 = vmatmul.mubr.msk.bf16.vlgmr.msra.gmra.mrb[4].mxu0 %vm545_vm2, %v1889_v25  ;;  %v782_v34 = vsel %vm545_vm2, %v777_v31, 0 }
 0x2ad   : > { %1482 = vmatprep.mubr.msk.bf16.mxu0 %vm1717_vm1, %v1716_v8 }
 0x2af   : > { %v775_v33 = vpop.permute.xlu1 %774 }
 0x2b0   : > { %1489 = vmatmul.mubr.msk.bf16.vlgmr.msra.gmra.mrb[0].mxu1 %vm545_vm2, %v657_v32 }
 0x2b1   : > { %1499 = vmatpush3.bf16.xpose.msra.mxu1 %v782_v34  ;;  %1500 = vmatprep.mubr.msk.bf16.mxu1 %vm1717_vm1, %v1716_v8 }
 0x2b2   : > { %1510 = vmatprep.subr.bf16.mxu1 %v1716_v8 }
 0x2b3   : > { %v895_v35 = vpop.permute.xlu1 %894 }
 0x2b4   : > { %v900_v36 = vsel %vm545_vm2, %v895_v35, 0 }
 0x2b7   : > { %v893_v37 = vpop.permute.xlu1 %892 }
 0x2b8   : > { %1501 = vmatmul.mubr.msk.bf16.vlgmr.msra.gmra.mrb[4].mxu1 %vm545_vm2, %v775_v33 }
 0x2b9   : > { %1511 = vmatpush3.bf16.xpose.msra.mxu1 %v900_v36  ;;  %1512 = vmatprep.mubr.msk.bf16.mxu1 %vm1717_vm1, %v1716_v8 }
 0x2ba   : > { %1522 = vmatprep.subr.bf16.mxu1 %v1716_v8 }
 0x2c0   : > { %1513 = vmatmul.mubr.msk.bf16.vlgmr.msra.gmra.mrb[8].mxu1 %vm545_vm2, %v893_v37 }
 0x2c1   : > { %1526 = vmatprep.mubr.msk.bf16.mxu1 %vm1717_vm1, %v1716_v8 }
 0x37f   : > { %v586_v41 = vpop.f32.mrb[4].mxu0 }
 0x380   : > { %v592_v42 = vmul.f32 0.35355338, %v586_v41  ;;  %v1478_v43 = vpop.f32.mrb[5].mxu0 }
 0x381   : > { %v589_v44 = vpop.f32.mrb[6].mxu0 }
 0x382   : > { %v1479_v45 = vpop.f32.mrb[7].mxu0  ;;  %v593_v46 = vsel %vm541_vm3, %v592_v42, -inf }
 0x383   : > { %v700_v47 = vpop.f32.mrb[0].mxu1  ;;  %v594_v48 = vsel %vm545_vm2, %v593_v46, -inf }
 0x384   : > { %v706_v49 = vmul.f32 0.35355338, %v700_v47  ;;  %v1490_v50 = vpop.f32.mrb[1].mxu1  ;;  %595 = vmax.xlane.f32.xlu1 %v594_v48 }
 0x385   : > { %v703_v51 = vpop.f32.mrb[2].mxu1 }
 0x386   : > { %v1491_v52 = vpop.f32.mrb[3].mxu1  ;;  %v707_v53 = vsel %vm541_vm3, %v706_v49, -inf }
 0x387   : > { %v708_v54 = vsel %vm545_vm2, %v707_v53, -inf }
 0x388   : > { %709 = vmax.xlane.f32.xlu0 %v708_v54 }
 0x38b   : > { %v818_v55 = vpop.f32.mrb[4].mxu1 }
 0x38c   : > { %v1502_v56 = vpop.f32.mrb[5].mxu1  ;;  %v824_v3 = vmul.f32 0.35355338, %v818_v55  ;;  %v1616_v55 = vld [vmem:[%s2082_s5] sm:$0xff]  }
 0x38d   : > { %v821_v57 = vpop.f32.mrb[6].mxu1  ;;  %1523 = vmatpush3.bf16.msra.mxu1 %v1616_v55 }
 0x38e   : > { %v1503_v58 = vpop.f32.mrb[7].mxu1  ;;  %v825_v4 = vsel %vm541_vm3, %v824_v3, -inf  ;;  %1524 = vmatprep.subr.bf16.mxu1 %v1716_v8 }
 0x38f   : > { %v826_v5 = vsel %vm545_vm2, %v825_v4, -inf  ;;  %v1617_v58 = vld [vmem:[%s2082_s5 + $0x8] sm:$0xff]  }
 0x391   : > { %1525 = vmatpush3.bf16.msra.mxu1 %v1617_v58 }
 0x392   : > { %1538 = vmatprep.subr.bf16.mxu1 %v1716_v8 }
 0x393   : > { %v936_v59 = vpop.f32.mrb[8].mxu1 }
 0x394   : > { %v942_v60 = vmul.f32 0.35355338, %v936_v59  ;;  %v1514_v61 = vpop.f32.mrb[9].mxu1 }
 0x395   : > { %v939_v62 = vpop.f32.mrb[10].mxu1  ;;  %604 = vrot.lane.b32.xlu1 %v1889_v25, %s1725_s15  ;;  %s1393_s15 = sshll.u32 %s429_s30, 3 }
 0x396   : > { %v1515_v63 = vpop.f32.mrb[11].mxu1  ;;  %v943_v1 = vsel %vm541_vm3, %v942_v60, -inf }
 0x397   : > { %v944_v2 = vsel %vm545_vm2, %v943_v1, -inf }
 0x398   : > { %945 = vmax.xlane.f32.xlu0 %v944_v2 }
 0x3ae   : > { %718 = vrot.lane.b32.xlu0 %v1889_v25, %s1726_s16  ;;  %s1730_s16 = smov 16  }
 0x3b9   : > { %827 = vmax.xlane.f32.xlu1 %v826_v5 }
 0x3ca   : > { %836 = vrot.lane.b32.xlu1 %v1889_v25, %s1727_s20  ;;  %s1731_s20 = smov 24  }
 0x3ce   : > { %954 = vrot.lane.b32.xlu1 %v1889_v25, %s1728_s21  ;;  %s1429_s21 = sshll.u32 %s1825_s29, 7  ;;  %s1317_s29 = scalar_lea.sflag [#allocation4], %s429_s30 }
 0x3cf   : > { %s2034_s1 = scalar_lea.hbm %s2090_s13, %s1429_s21 }
 0x411   : > { %v596_v6 = vpop.xlane.xlu1 %595 }
 0x412   : > { %v597_v7 = vsub.f32 %v593_v46, %v596_v6 }
 0x414   : > { %v598_v9 = vmul.f32 1.442695, %v597_v7 }
 0x415   : > { %v710_v10 = vpop.xlane.xlu0 %709  ;;  %v605_v11 = vpop.permute.xlu1 %604 }
 0x416   : > { %1630 = vpow2.f32 %v598_v9  ;;  %v711_v12 = vsub.f32 %v707_v53, %v710_v10  ;;  %v611_v13 = vsel %vm609_vm4, %v605_v11, 0 }
 0x417   : > { %1481 = vmatpush3.bf16.msra.mxu0 %v611_v13 }
 0x418   : > { %v712_v14 = vmul.f32 1.442695, %v711_v12  ;;  %1492 = vmatprep.subr.bf16.mxu0 %v1716_v8  ;;  %v1409_v12 = vld [vmem:[%s2083_s6] ss:$0 sm:$0xff] }
 0x41a   : > { %1632 = vpow2.f32 %v712_v14 }
 0x420   : > { %v1631_v15 = vpop.eup %1630 }
 0x421   : > { %v603_v16 = vpack.c.bf16 %v1631_v15, %v1631_v15  ;;  %v600_v27 = vsel %vm545_vm2, %v1631_v15, 0.0 }
 0x423   : > { %1483 = vmatmul.mubr.msk.bf16.vlgmr.msra.gmra.mrb[8].mxu0 %vm545_vm2, %v603_v16 }
 0x424   : > { %v1633_v17 = vpop.eup %1632  ;;  %1494 = vmatprep.mubr.msk.bf16.mxu0 %vm1717_vm1, %v1716_v8 }
 0x425   : > { %v946_v18 = vpop.xlane.xlu0 %945  ;;  %v714_v19 = vsel %vm545_vm2, %v1633_v17, 0.0  ;;  %v717_v24 = vpack.c.bf16 %v1633_v17, %v1633_v17 }
 0x426   : > { %v947_v20 = vsub.f32 %v943_v1, %v946_v18  ;;  %715 = vadd.xlane.f32.xlu0 %v714_v19 }
 0x428   : > { %v948_v21 = vmul.f32 1.442695, %v947_v20 }
 0x429   : > { %v719_v22 = vpop.permute.xlu0 %718 }
 0x42a   : > { %1634 = vpow2.f32 %v948_v21  ;;  %v724_v23 = vsel %vm609_vm4, %v719_v22, 0 }
 0x42b   : > { %1493 = vmatpush3.bf16.msra.mxu0 %v724_v23 }
 0x42c   : > { %1504 = vmatprep.subr.bf16.mxu0 %v1716_v8 }
 0x42e   : > { %1495 = vmatmul.mubr.msk.bf16.vlgmr.msra.gmra.mrb[12].mxu0 %vm545_vm2, %v717_v24 }
 0x42f   : > { %1506 = vmatprep.mubr.msk.bf16.mxu0 %vm1717_vm1, %v1716_v8 }
 0x434   : > { %v1635_v25 = vpop.eup %1634 }
 0x435   : > { %v950_v26 = vsel %vm545_vm2, %v1635_v25, 0.0  ;;  %v953_v38 = vpack.c.bf16 %v1635_v25, %v1635_v25  ;;  %v1618_v25 = vld [vmem:[%s2086_s9] sm:$0xff]  }
 0x436   : > { %951 = vadd.xlane.f32.xlu0 %v950_v26 }
 0x43a   : > { %601 = vadd.xlane.f32.xlu0 %v600_v27 }
 0x446   : > { %v828_v28 = vpop.xlane.xlu1 %827 }
 0x447   : > { %v829_v29 = vsub.f32 %v825_v4, %v828_v28 }
 0x449   : > { %v830_v30 = vmul.f32 1.442695, %v829_v29 }
 0x44a   : > { %v837_v31 = vpop.permute.xlu1 %836 }
 0x44b   : > { %1636 = vpow2.f32 %v830_v30  ;;  %v842_v32 = vsel %vm609_vm4, %v837_v31, 0  ;;  %v1413_v30 = vld [vmem:[%s2084_s7] ss:$0 sm:$0xff] }
 0x44c   : > { %1505 = vmatpush3.bf16.msra.mxu0 %v842_v32  ;;  %v1414_v32 = vld [vmem:[%s2085_s8] ss:$0 sm:$0xff] }
 0x44d   : > { %1516 = vmatprep.subr.bf16.mxu0 %v1716_v8 }
 0x44e   : > { %v955_v34 = vpop.permute.xlu1 %954 }
 0x44f   : > { %v960_v37 = vsel %vm609_vm4, %v955_v34, 0 }
 0x455   : > { %v1637_v33 = vpop.eup %1636 }
 0x456   : > { %v832_v35 = vsel %vm545_vm2, %v1637_v33, 0.0  ;;  %v835_v36 = vpack.c.bf16 %v1637_v33, %v1637_v33 }
 0x457   : > { %833 = vadd.xlane.f32.xlu1 %v832_v35 }
 0x458   : > { %1507 = vmatmul.mubr.msk.bf16.vlgmr.msra.gmra.mrb[16].mxu0 %vm545_vm2, %v835_v36  ;;  %v1620_v36 = vld [vmem:[%s2088_s11] sm:$0xff]  }
 0x459   : > { %1517 = vmatpush3.bf16.msra.mxu0 %v960_v37  ;;  %1518 = vmatprep.mubr.msk.bf16.mxu0 %vm1717_vm1, %v1716_v8  ;;  %v1621_v37 = vld [vmem:[%s2088_s11 + $0x8] sm:$0xff]  }
 0x45a   : > { %1530 = vmatprep.subr.bf16.mxu0 %v1716_v8 }
 0x460   : > { %1519 = vmatmul.mubr.msk.bf16.vlgmr.msra.gmra.mrb[20].mxu0 %vm545_vm2, %v953_v38  ;;  %v1622_v38 = vld [vmem:[%s2088_s11 + $0x10] sm:$0xff]  }
 0x461   : > { %1534 = vmatprep.mubr.msk.bf16.mxu0 %vm1717_vm1, %v1716_v8  ;;  %1531 = vmatpush3.bf16.msra.mxu0 %v1618_v25 }
 0x462   : > { %1532 = vmatprep.subr.bf16.mxu0 %v1716_v8 }
 0x4b3   : > { %v716_v39 = vpop.xlane.xlu0 %715 }
 0x4c3   : > { %v952_v40 = vpop.xlane.xlu0 %951 }
 0x4c7   : > { %v602_v41 = vpop.xlane.xlu0 %601 }
 0x4c8   : > { %1638 = vrcp.f32 %v602_v41  ;;  %v1625_v41 = vld [vmem:[%s2088_s11 + $0x28] sm:$0xff]  }
 0x4c9   : > { %1640 = vrcp.f32 %v716_v39  ;;  %v1623_v39 = vld [vmem:[%s2088_s11 + $0x18] sm:$0xff]  }
 0x4d2   : > { %v1639_v42 = vpop.eup %1638 }
 0x4d3   : > { %v1641_v48 = vpop.eup %1640 }
 0x4e4   : > { %v834_v54 = vpop.xlane.xlu1 %833 }
 0x4e5   : > { %1642 = vrcp.f32 %v834_v54 }
 0x4e6   : > { %1644 = vrcp.f32 %v952_v40  ;;  %v1624_v40 = vld [vmem:[%s2088_s11 + $0x20] sm:$0xff]  }
 0x4ef   : > { %v1643_v56 = vpop.eup %1642 }
 0x4f0   : > { %v1645_v63 = vpop.eup %1644 }
 0x4f6   : > { %v647_v43 = vpop.f32.mrb[8].mxu0 }
 0x4f7   : > { %v654_v44 = vmul.f32 %v1639_v42, %v647_v43  ;;  %v1484_v45 = vpop.f32.mrb[9].mxu0  ;;  %v1626_v42 = vld [vmem:[%s2088_s11 + $0x30] sm:$0xff]   ;;  %v1627_v43 = vld [vmem:[%s2088_s11 + $0x38] sm:$0xff]  }
 0x4f8   : > { %v650_v46 = vpop.f32.mrb[10].mxu0 }
 0x4f9   : > { %655 = vst.msk [vmem:[#allocation2] sm:$0xff] %vm545_vm2, %v654_v44  ;;  %v1485_v47 = vpop.f32.mrb[11].mxu0  ;;  %v1415_v44 = vld [vmem:[%s2087_s10] ss:$0 sm:$0xff] }
 0x501   : > { %v760_v49 = vpop.f32.mrb[12].mxu0 }
 0x502   : > { %v767_v50 = vmul.f32 %v1641_v48, %v760_v49  ;;  %v1496_v51 = vpop.f32.mrb[13].mxu0 }
 0x503   : > { %v763_v52 = vpop.f32.mrb[14].mxu0 }
 0x504   : > { %769 = vrot.lane.b32.xlu1 %v767_v50, %s1729_s22  ;;  %v1497_v53 = vpop.f32.mrb[15].mxu0  ;;  %s431_s22 = scalar_lea.vmem [#allocation3], %s1393_s15 }
 0x505   : > { %s1330_s23 = sshll.u32 %s431_s22, 4  ;;  %s2036_s23 = int_to_ptr.vmem [resolvable:$true] %s1330_s23 }
 0x506   : > { %s1652_s15 = scalar_lea.vmem %s2036_s23, 128 }
 0x507   : > { %p1653_p11 = scmp.ne.s32.totalorder %s2036_s23, %s1652_s15 }
 0x509   : > { %p1654_p12 = pnand %p1653_p11, %p1842_p5 }
 0x50b   : > { %p1655_p13 = pneg %p1654_p12 }
 0x52b   : > { %v878_v57 = vpop.f32.mrb[16].mxu0 }
 0x52c   : > { %v885_v59 = vmul.f32 %v1643_v56, %v878_v57  ;;  %v1508_v60 = vpop.f32.mrb[17].mxu0 }
 0x52d   : > { %v881_v61 = vpop.f32.mrb[18].mxu0 }
 0x52e   : > { %887 = vrot.lane.b32.xlu0 %v885_v59, %s1730_s16  ;;  %v1509_v62 = vpop.f32.mrb[19].mxu0  ;;  %s1733_s16 = smov [#allocation3]  }
 0x533   : > { %v996_v1 = vpop.f32.mrb[20].mxu0 }
 0x534   : > { %v1003_v2 = vmul.f32 %v1645_v63, %v996_v1  ;;  %v1520_v3 = vpop.f32.mrb[21].mxu0 }
 0x535   : > { %v999_v4 = vpop.f32.mrb[22].mxu0 }
 0x536   : > { %1005 = vrot.lane.b32.xlu1 %v1003_v2, %s1731_s20  ;;  %v1521_v5 = vpop.f32.mrb[23].mxu0  ;;  %s1656_s20 = sshll.u32 %s1733_s16, 4  ;;  %s1657_s20 = int_to_ptr.vmem [resolvable:$false] %s1656_s20 }
 0x537   : > { %s1658_s2 = scalar_lea.vmem %s1657_s20, 256  ;;  %p1659_p0 = scmp.lt.s32.totalorder %s2036_s23, %s1657_s20 }
 0x538   : > { %p1660_p1 = scmp.lt.s32.totalorder %s1658_s2, %s1652_s15 }
 0x53a   : > { %p1661_p2 = por %p1660_p1, %p1659_p0 }
 0x53c   : > { %p1662_p3 = pnand %p1661_p2, %p1655_p13 }
 0x576   : > { %v770_v6 = vpop.permute.xlu1 %769 }
 0x577   : > { %773 = vst.msk [vmem:[#allocation2] sm:$0xff] %vm772_vm5, %v770_v6  ;;  %v1732_v6 = vmov -1.0  }
 0x5a0   : > { %v888_v7 = vpop.permute.xlu0 %887 }
 0x5a1   : > { %891 = vst.msk [vmem:[#allocation2] sm:$0xff] %vm890_vm6, %v888_v7 }
 0x5a8   : > { %v1006_v9 = vpop.permute.xlu1 %1005 }
 0x5a9   : > { %1009 = vst.msk [vmem:[#allocation2] sm:$0xff] %vm1008_vm7, %v1006_v9 }
 0x5b0   : > { %v1010_v10 = vld [vmem:[#allocation2] sm:$0xff] }
 0x5b1   : > { %v1011_v11 = vpack.c.bf16 %v1010_v10, %v1010_v10 }
 0x5b3   : > { %1527 = vmatmul.mubr.msk.bf16.vlgmr.msra.gmra.mrb[12].mxu1 %vm440_vm0, %v1011_v11 }
 0x5b4   : > { %1554 = vmatprep.mubr.msk.bf16.mxu1 %vm1717_vm1, %v1716_v8  ;;  %1539 = vmatpush3.bf16.msra.mxu1 %v1620_v36 }
 0x5b5   : > { %1540 = vmatprep.subr.bf16.mxu1 %v1716_v8 }
 0x5b8   : > { %1541 = vmatpush3.bf16.msra.mxu1 %v1621_v37 }
 0x5b9   : > { %1542 = vmatprep.subr.bf16.mxu1 %v1716_v8 }
 0x5bc   : > { %1543 = vmatpush3.bf16.msra.mxu1 %v1622_v38 }
 0x5bd   : > { %1544 = vmatprep.subr.bf16.mxu1 %v1716_v8 }
 0x5c0   : > { %1545 = vmatpush3.bf16.msra.mxu1 %v1623_v39 }
 0x5c1   : > { %1546 = vmatprep.subr.bf16.mxu1 %v1716_v8 }
 0x5c4   : > { %1547 = vmatpush3.bf16.msra.mxu1 %v1624_v40 }
 0x5c5   : > { %1548 = vmatprep.subr.bf16.mxu1 %v1716_v8 }
 0x5c8   : > { %1549 = vmatpush3.bf16.msra.mxu1 %v1625_v41 }
 0x5c9   : > { %1550 = vmatprep.subr.bf16.mxu1 %v1716_v8 }
 0x5cc   : > { %1551 = vmatpush3.bf16.msra.mxu1 %v1626_v42 }
 0x5cd   : > { %1552 = vmatprep.subr.bf16.mxu1 %v1716_v8 }
 0x5d0   : > { %1553 = vmatpush3.bf16.msra.mxu1 %v1627_v43 }
 0x686   : > { %v1072_v13 = vpop.f32.mrb[12].mxu1 }
 0x687   : > { %v1073_v14 = vadd.f32 %v1409_v12, %v1072_v13  ;;  %v1528_v15 = vpop.f32.mrb[13].mxu1 }
 0x688   : > { %v1075_v16 = vpop.f32.mrb[14].mxu1 }
 0x689   : > { %v1971_v17 = vadd.f32 %v1073_v14, %v1857_v0  ;;  %v1529_v18 = vpop.f32.mrb[15].mxu1  ;;  %v1619_v0 = vld [vmem:[%s2086_s9 + $0x8] sm:$0xff]   ;;  %v1419_v14 = vld [vmem:[%s2089_s12] ss:$0 sm:$0xff] }
 0x68a   : > { %1533 = vmatpush3.bf16.msra.mxu0 %v1619_v0 }
 0x68b   : > { %v1081_v19 = vsel %vm440_vm0, %v1971_v17, 0.0 }
 0x68c   : > { %1082 = vadd.xlane.f32.xlu1 %v1081_v19 }
 0x719   : > { %v1083_v20 = vpop.xlane.xlu1 %1082 }
 0x71a   : > { %v1084_v21 = vmul.f32 0.03125, %v1083_v20 }
 0x71c   : > { %v1085_v22 = vsub.f32 %v1971_v17, %v1084_v21 }
 0x71e   : > { %v1086_v23 = vmul.f32 %v1085_v22, %v1085_v22 }
 0x720   : > { %v1087_v24 = vsel %vm440_vm0, %v1086_v23, 0.0 }
 0x721   : > { %1088 = vadd.xlane.f32.xlu0 %v1087_v24 }
 0x7ae   : > { %v1089_v26 = vpop.xlane.xlu0 %1088 }
 0x7af   : > { %v1090_v27 = vmul.f32 0.03125, %v1089_v26 }
 0x7b1   : > { %v1091_v28 = vadd.f32 1e-05, %v1090_v27 }
 0x7b3   : > { %1646 = vrsqrt.f32 %v1091_v28 }
 0x7bd   : > { %v1647_v29 = vpop.eup %1646 }
 0x7be   : > { %v1093_v31 = vmul.f32 %v1647_v29, %v1085_v22 }
 0x7c0   : > { %v1100_v33 = vmul.f32 %v1413_v30, %v1093_v31 }
 0x7c2   : > { %v1107_v34 = vadd.f32 %v1414_v32, %v1100_v33 }
 0x7c4   : > { %v1108_v35 = vpack.c.bf16 %v1107_v34, %v1107_v34 }
 0x7c6   : > { %1535 = vmatmul.mubr.msk.bf16.vlgmr.msra.gmra.mrb[24].mxu0 %vm440_vm0, %v1108_v35 }
 0x899   : > { %v1169_v45 = vpop.f32.mrb[24].mxu0 }
 0x89a   : > { %v1170_v46 = vadd.f32 %v1415_v44, %v1169_v45  ;;  %v1536_v47 = vpop.f32.mrb[25].mxu0 }
 0x89b   : > { %v1172_v48 = vpop.f32.mrb[26].mxu0 }
 0x89c   : > { %v1176_v49 = vmul.f32 0.70710677, %v1170_v46  ;;  %v1537_v50 = vpop.f32.mrb[27].mxu0  ;;  %v1175_v10 = vmul.f32 0.5, %v1170_v46 }
 0x89e   : > { %v1179_v51 = vand.u32 2147483647, %v1176_v49  ;;  %vm1177_vm8 = vcmp.ge.f32.partialorder %v1176_v49, 0.0 }
 0x89f   : > { %v1178_v7 = vsel %vm1177_vm8, 1.0, %v1732_v6 }
 0x8a0   : > { %v1180_v52 = vmul.f32 0.3275911, %v1179_v51  ;;  %v1193_v8 = vsub.f32 0.0, %v1179_v51 }
 0x8a2   : > { %v1181_v53 = vadd.f32 1.0, %v1180_v52  ;;  %v1194_v55 = vmul.f32 %v1193_v8, %v1179_v51 }
 0x8a4   : > { %1648 = vrcp.f32 %v1181_v53  ;;  %v1195_v58 = vmul.f32 1.442695, %v1194_v55 }
 0x8a6   : > { %1650 = vpow2.f32 %v1195_v58 }
 0x8ae   : > { %v1649_v54 = vpop.eup %1648 }
 0x8af   : > { %v1184_v56 = vmul.f32 1.0614054, %v1649_v54 }
 0x8b0   : > { %v1651_v3 = vpop.eup %1650 }
 0x8b1   : > { %v1185_v57 = vadd.f32 -1.4531521, %v1184_v56 }
 0x8b3   : > { %v1186_v59 = vmul.f32 %v1649_v54, %v1185_v57 }
 0x8b5   : > { %v1187_v60 = vadd.f32 1.4214138, %v1186_v59 }
 0x8b7   : > { %v1188_v61 = vmul.f32 %v1649_v54, %v1187_v60 }
 0x8b9   : > { %v1189_v62 = vadd.f32 -0.28449672, %v1188_v61 }
 0x8bb   : > { %v1190_v63 = vmul.f32 %v1649_v54, %v1189_v62 }
 0x8bd   : > { %v1191_v1 = vadd.f32 0.2548296, %v1190_v63 }
 0x8bf   : > { %v1192_v2 = vmul.f32 %v1649_v54, %v1191_v1 }
 0x8c1   : > { %v1197_v4 = vmul.f32 %v1651_v3, %v1192_v2 }
 0x8c3   : > { %v1198_v5 = vsub.f32 1.0, %v1197_v4 }
 0x8c5   : > { %v1199_v9 = vmul.f32 %v1198_v5, %v1178_v7 }
 0x8c7   : > { %v1200_v11 = vadd.f32 1.0, %v1199_v9 }
 0x8c9   : > { %v1201_v12 = vmul.f32 %v1200_v11, %v1175_v10 }
 0x8cb   : > { %v1202_v13 = vpack.c.bf16 %v1201_v12, %v1201_v12 }
 0x8cd   : > { %1555 = vmatmul.mubr.bf16.vlgmr.msra.gmra.mrb[16].mxu1 %v1202_v13 }
 0x9a0   : > { %v1308_v15 = vpop.f32.mrb[16].mxu1 }
 0x9a1   : > { %v1309_v16 = vadd.f32 %v1419_v14, %v1308_v15  ;;  %v1556_v18 = vpop.f32.mrb[17].mxu1 }
 0x9a2   : > { %v1311_v19 = vpop.f32.mrb[18].mxu1 }
 0x9a3   : > { %v1314_v20 = vadd.f32 %v1309_v16, %v1971_v17  ;;  %v1557_v21 = vpop.f32.mrb[19].mxu1 }
 0x9a5   : > { %1315 = vst.msk [vmem:[%s431_s22] sm:$0xff] %vm440_vm0, %v1314_v20 }
 0x9a6   : > { %1665 = shalt.err (!%p1662_p3)
}
 0x9a7   : > { %s1666_s0 = scalar_lea.hbm %s2034_s1, 128  ;;  %s1670_s22 = scalar_lea.hbm %s2090_s13, 256 }
 0x9a8   : > { %p1667_p4 = scmp.ne.s32.totalorder %s2034_s1, %s1666_s0  ;;  %p1671_p9 = scmp.lt.u32.totalorder %s2034_s1, %s2090_s13 }
 0x9a9   : > { %p1672_p10 = scmp.lt.u32.totalorder %s1670_s22, %s1666_s0  ;;  %p1674_p12 = scmp.lt.u32.totalorder %s1666_s0, %s2034_s1 }
 0x9aa   : > { %p1668_p7 = pnand %p1667_p4, %p1842_p5 }
 0x9ab   : > { %p1673_p11 = por %p1672_p10, %p1671_p9 }
 0x9ac   : > { %p1669_p8 = pneg %p1668_p7 }
 0x9ad   : > { %p1675_p13 = por %p1674_p12, %p1673_p11 }
 0x9af   : > { %p1676_p0 = pnand %p1675_p13, %p1669_p8 }
 0x9b1   : > { %1679 = shalt.err (!%p1676_p0)
}
 0x9b2   : > { %1558 = dma.vmem_to_hbm [thread:$0]  (%p1842_p5), %s2036_s23, 128, %s2034_s1, %s1317_s29  }
 0x9b3 PF: > { %p1564_p1 = scmp.ge.s32.totalorder %s1714_s28, 2  ;;  %s1342_s2 = sand.u32 1, %s1702_s25  }
 0x9b4   : > { %s1343_s15 = scalar_lea.sflag [#allocation4], %s1342_s2 }
 0x9b5   : > { %p1561_p2 = pnand %p1564_p1, %p1846_p6 }
 0x9b7   : > { %1697 = dma.done.wait (!%p1561_p2), %s1343_s15, 128  }
 0x9b8   : > { %1699 = vsyncadd (!%p1561_p2), %s1343_s15, 4294967168  ;;  %p23_p3 = scmp.ge.s32.totalorder %s1829_s14, 4   ;;  %s2099_s25 = smov %s1706_s26 }
 0x9b9   : > { %s2100_s26 = smov %s1710_s27  ;;  %s2101_s27 = smov %s1840_s17 }
 0x9ba   : > { %s2102_s28 = smov %s1829_s14  ;;  %25 = sbr.rel (!%p23_p3) target bundleno = 7 (0x7), region = 107 }
 0x9c1   :  { %1348 = vsyncpa [#allocation4], 1 }
 0x9c2   :  { %1350 = vsyncpa [#allocation4 + $0x1], 1 }

</bundles_post_ra>
